<compile_context>
chip_gen: v5e
topology: v5e:2x2
jax: 0.10.0
libtpu: 0.0.40
codegen_flags: <defaults>
</compile_context>

<pallas_src>
import functools

import jax
import jax.numpy as jnp
from jax import lax
from jax.experimental import pallas as pl
from jax.experimental.pallas import tpu as pltpu


def _activation_kernel(x_ref, w_ref, b_ref, o_ref):
    # x_ref: [TM, LANE]   lane-dense slab (p original rows packed per slab row)
    # w_ref: [LANE, LANE] kron(I_p, W) with W in PyTorch (out, in) layout
    # b_ref: [1,  LANE]   bias tiled p times, f32
    x = x_ref[...]
    w = w_ref[...]
    # y = x @ W^T : contract x's feature dim with w's "in" dim (no transpose
    # materialized anywhere); accumulate in f32 on the MXU.
    y = lax.dot_general(
        x, w,
        dimension_numbers=(((1,), (1,)), ((), ())),
        preferred_element_type=jnp.float32,
    )
    y = y + b_ref[...]                       # bias is already f32
    o_ref[...] = jnp.tanh(y).astype(o_ref.dtype)


def _round_up(x: int, m: int) -> int:
    return -(-x // m) * m


def _choose_tm(ms: int, tm_rows: int) -> int:
    """Pick the M tile (in slab rows).

    * tiny inputs -> single tile (block == full dim, so no 8-divisibility issue)
    * enough work -> >= 2 tiles so both v7x TensorCores get a share, capped at
      tm_rows (default 8192 rows = 4 MiB f32 block, 16 MiB double-buffered).
    """
    if ms <= tm_rows and ms < 2048:
        return ms
    tm = min(tm_rows, _round_up(-(-ms // 2), 8))
    return max(8, tm)


@functools.partial(jax.jit, static_argnames=("tm_rows",))
def _activation_forward_packed(x, w_block, b_lane, *, tm_rows=8192):
    """x: [..., D]; w_block: [LANE, LANE] (= kron(I_p, W)); b_lane: [1, LANE] f32."""
    lane = w_block.shape[0]
    d = x.shape[-1]
    p = lane // d

    orig_shape = x.shape
    x2d = x.reshape(-1, d)
    m = x2d.shape[0]

    # Pad only to a multiple of p (<= p-1 rows); no padding at all if p | m.
    ms = -(-m // p)                      # slab rows
    pad_rows = ms * p - m
    if pad_rows:
        x2d = jnp.pad(x2d, ((0, pad_rows), (0, 0)))
    x_slab = x2d.reshape(ms, lane)       # row-major reshape: free, no data movement

    tm = _choose_tm(ms, tm_rows)
    n_tiles = -(-ms // tm)               # ragged last block handled (masked) by Pallas

    out_dtype = x.dtype
    itemsize = jnp.dtype(out_dtype).itemsize
    cost = pl.CostEstimate(
        flops=2 * ms * lane * lane,
        transcendentals=ms * lane,
        bytes_accessed=2 * ms * lane * itemsize
        + lane * lane * jnp.dtype(w_block.dtype).itemsize
        + lane * 4,
    )

    out_slab = pl.pallas_call(
        _activation_kernel,
        out_shape=jax.ShapeDtypeStruct((ms, lane), out_dtype),
        grid_spec=pltpu.PrefetchScalarGridSpec(
            num_scalar_prefetch=0,
            grid=(n_tiles,),
            in_specs=[
                pl.BlockSpec((tm, lane), lambda i: (i, 0)),     # streamed x tiles
                pl.BlockSpec((lane, lane), lambda i: (0, 0)),   # resident weight
                pl.BlockSpec((1, lane), lambda i: (0, 0)),      # resident bias (f32)
            ],
            out_specs=pl.BlockSpec((tm, lane), lambda i: (i, 0)),
        ),
        compiler_params=pltpu.CompilerParams(
            dimension_semantics=("parallel",),    # M tiles independent -> megacore
            vmem_limit_bytes=32 * 1024 * 1024,    # safe on v5e / v6e / v7x
        ),
        cost_estimate=cost,
    )(x_slab, w_block, b_lane)

    if pad_rows:
        out = out_slab.reshape(ms * p, d)[:m]    # only when m % p != 0
    else:
        out = out_slab.reshape(m, d)             # free reshape, no copy
    return out.reshape(orig_shape)


class Activation:
    """JAX/Pallas port of the PyTorch Activation module.

    weight: [D, D] in PyTorch nn.Linear (out, in) layout; bias: [D].
    The lane-packed weight kron(I_p, W) and f32 bias slab are precomputed once
    here (hoisted out of the per-call path).
    Note: if D does not divide 128 the code falls back to p=1 (lane = D < 128),
    which is correct but hits masked partial stores — a perf cliff only.
    """

    def __init__(self, weight, bias):
        d = weight.shape[0]
        p = 128 // d if (d <= 128 and 128 % d == 0) else 1
        lane = p * d
        self.encoding_dim = d
        self.p = p
        self.lane = lane
        self.w_block = (
            jnp.kron(jnp.eye(p, dtype=weight.dtype), weight) if p > 1 else weight
        )
        # Bias stays f32 regardless of activation dtype: it is resident in VMEM
        # (<= 512 B), so f32 costs nothing in HBM traffic but keeps accuracy.
        self.b_lane = jnp.tile(bias.astype(jnp.float32), p).reshape(1, lane)

    def __call__(self, x, *, tm_rows=8192):
        return _activation_forward_packed(x, self.w_block, self.b_lane,
                                          tm_rows=tm_rows)


if __name__ == "__main__":
    encoding_dim = 32
    batch, seq = 2, 8

    key = jax.random.PRNGKey(0)
    kx, kw, kb = jax.random.split(key, 3)

    # Deterministic parameter init (mimics nn.Linear uniform(-1/sqrt(d), 1/sqrt(d)))
    bound = 1.0 / (encoding_dim ** 0.5)
    weight = jax.random.uniform(kw, (encoding_dim, encoding_dim),
                                jnp.float32, -bound, bound)   # (out, in)
    bias = jax.random.uniform(kb, (encoding_dim,), jnp.float32, -bound, bound)

    act_f32 = Activation(weight, bias)

    x = jax.random.normal(kx, (batch, seq, encoding_dim), jnp.float32)
    out = act_f32(x)
    jax.block_until_ready(out)

    ref = jnp.tanh(x @ weight.T + bias)
    assert out.shape == x.shape
    assert jnp.allclose(out, ref, atol=1e-5, rtol=1e-5)

    # bf16 activation path: halves HBM traffic on this bandwidth-bound op.
    # Weight is bf16 (uniform MXU dtype), bias stays f32 inside Activation.
    act_bf16 = Activation(weight.astype(jnp.bfloat16), bias)
    out_bf16 = act_bf16(x.astype(jnp.bfloat16))
    jax.block_until_ready(out_bf16)
    assert out_bf16.dtype == jnp.bfloat16
    assert jnp.allclose(out_bf16.astype(jnp.float32), ref, atol=3e-2, rtol=3e-2)

    # Multi-tile pipelined path, m % p == 0: no wrapper pad and no output slice.
    mid_x = jax.random.normal(kx, (16384, encoding_dim), jnp.float32)
    mid_out = act_f32(mid_x)
    jax.block_until_ready(mid_out)
    mid_ref = jnp.tanh(mid_x @ weight.T + bias)
    assert jnp.allclose(mid_out, mid_ref, atol=1e-5, rtol=1e-5)

    # Ragged path (m % p != 0, ragged last grid block): pads <= p-1 rows only.
    big_x = jax.random.normal(kx, (4096 * 5 + 7, encoding_dim), jnp.float32)
    big_out = act_f32(big_x)
    jax.block_until_ready(big_out)
    big_ref = jnp.tanh(big_x @ weight.T + bias)
    assert big_out.shape == big_x.shape
    assert jnp.allclose(big_out, big_ref, atol=1e-5, rtol=1e-5)

    print("KERNEL_OK")
</pallas_src>

<mosaic_0001>
module attributes {stable_mosaic.version = 11 : i64} {
  func.func @_activation_kernel(%arg0: i32, %arg1: memref<4x128xf32, #tpu.memory_space<vmem>>, %arg2: memref<128x128xf32, #tpu.memory_space<vmem>>, %arg3: memref<1x128xf32, #tpu.memory_space<vmem>>, %arg4: memref<4x128xf32, #tpu.memory_space<vmem>>) attributes {dimension_semantics = [#tpu.dimension_semantics<parallel>], iteration_bounds = array<i64: 1>, scalar_prefetch = 0 : i64, scratch_operands = 0 : i64, tpu.core_type = #tpu.core_type<tc>, window_params = [{transform_indices = @transform_0, window_bounds = array<i64: 4, 128>}, {pipeline_mode = #tpu.pipeline_mode<synchronous>, transform_indices = @transform_1, window_bounds = array<i64: 128, 128>}, {pipeline_mode = #tpu.pipeline_mode<synchronous>, transform_indices = @transform_2, window_bounds = array<i64: 1, 128>}, {transform_indices = @transform_3, window_bounds = array<i64: 4, 128>}]} {
    %c0 = arith.constant 0 : index
    %c0_0 = arith.constant 0 : index
    %0 = vector.load %arg1[%c0, %c0_0] : memref<4x128xf32, #tpu.memory_space<vmem>>, vector<4x128xf32>
    %c0_1 = arith.constant 0 : index
    %c0_2 = arith.constant 0 : index
    %1 = vector.load %arg2[%c0_1, %c0_2] : memref<128x128xf32, #tpu.memory_space<vmem>>, vector<128x128xf32>
    %cst = arith.constant dense<0.000000e+00> : vector<4x128xf32>
    %2 = tpu.matmul %0, %1, %cst {dimension_numbers = #tpu.dot_dimension_numbers<[1], [1], [0], [0], [0, 0, 1, 0], [], []>} : vector<4x128xf32>, vector<128x128xf32>, vector<4x128xf32> -> vector<4x128xf32>
    %c0_3 = arith.constant 0 : index
    %c0_4 = arith.constant 0 : index
    %3 = vector.load %arg3[%c0_3, %c0_4] : memref<1x128xf32, #tpu.memory_space<vmem>>, vector<1x128xf32>
    %4 = vector.broadcast %3 : vector<1x128xf32> to vector<4x128xf32>
    %5 = arith.addf %2, %4 : vector<4x128xf32>
    %6 = math.tanh %5 : vector<4x128xf32>
    %c0_5 = arith.constant 0 : index
    %c0_6 = arith.constant 0 : index
    %7 = vector.load %arg4[%c0_5, %c0_6] : memref<4x128xf32, #tpu.memory_space<vmem>>, vector<4x128xf32>
    tpu.vector_store %arg4[%c0_5, %c0_6], %6 {strides = array<i32>} : memref<4x128xf32, #tpu.memory_space<vmem>>, vector<4x128xf32>,
    return
  }
  func.func @transform_0(%arg0: i32) -> (i32, i32) {
    %c0_i32 = arith.constant 0 : i32
    %c0_i32_0 = arith.constant 0 : i32
    return %arg0, %c0_i32 : i32, i32
  }
  func.func @transform_1(%arg0: i32) -> (i32, i32) {
    %c0_i32 = arith.constant 0 : i32
    %c0_i32_0 = arith.constant 0 : i32
    %c0_i32_1 = arith.constant 0 : i32
    return %c0_i32, %c0_i32_0 : i32, i32
  }
  func.func @transform_2(%arg0: i32) -> (i32, i32) {
    %c0_i32 = arith.constant 0 : i32
    %c0_i32_0 = arith.constant 0 : i32
    %c0_i32_1 = arith.constant 0 : i32
    return %c0_i32, %c0_i32_0 : i32, i32
  }
  func.func @transform_3(%arg0: i32) -> (i32, i32) {
    %c0_i32 = arith.constant 0 : i32
    %c0_i32_0 = arith.constant 0 : i32
    return %arg0, %c0_i32 : i32, i32
  }
}

</mosaic_0001>

<bundles_post_ra>
// kernel: _activation_forward_packed.1
= control target key start
LH: loop header
LB: loop body
LE: loop exit
PB: predicated region body
PF: predicated region fallthrough
CT: control target
= control target key end

     0   :  { %8 = vsyncpa [#allocation3], 0  ;;  %s110_s15 = smov [#allocation2]   ;;  %s111_s17 = smov 128   ;;  %s145_s0 = inlined_call_operand.vmem [shape: f32[4,128], index: 0, kind: input, shape index: {}]   ;;  %s146_s1 = inlined_call_operand.hbm [shape: f32[128,128], index: 1, kind: input, shape index: {}]   ;;  %s147_s2 = inlined_call_operand.vmem [shape: f32[1,128], index: 2, kind: input, shape index: {}]   ;;  %s148_s3 = inlined_call_operand.vmem [shape: f32[4,128], index: 3, kind: output, shape index: {}]  }
   0x1   :  { %s15_s14 = sshll.u32 %s146_s1, 4  ;;  %s17_s16 = sshll.u32 %s110_s15, 4  ;;  %s16_s14 = int_to_ptr.hbm [resolvable:$true] %s15_s14  ;;  %s18_s16 = int_to_ptr.vmem [resolvable:$true] %s17_s16 }
   0x2   :  { %s112_s18 = smov 8  }
   0x3   :  { %23 = dma.hbm_to_vmem [thread:$0]  %s16_s14, 2048, %s18_s16, [#allocation3], %s111_s17, %s111_s17, %s112_s18  }
   0x4   :  { %108 = dma.done.wait [#allocation3], 2048  }
   0x5   :  { %109 = vsyncadd [#allocation3], 4294965248  ;;  %v46_v0 = vld [vmem:[#allocation2 + $0x78] sm:$0xff]  ;;  %v45_v1 = vld [vmem:[#allocation2 + $0x70] sm:$0xff] }
   0x6   :  { %51 = vmatpush.xpose.msra.mxu0 %v46_v0  ;;  %v44_v2 = vld [vmem:[#allocation2 + $0x68] sm:$0xff]  ;;  %v43_v3 = vld [vmem:[#allocation2 + $0x60] sm:$0xff]  ;;  %v42_v4 = vld [vmem:[#allocation2 + $0x58] sm:$0xff] }
   0x7   :  { %v41_v5 = vld [vmem:[#allocation2 + $0x50] sm:$0xff]  ;;  %v40_v6 = vld [vmem:[#allocation2 + $0x48] sm:$0xff]  ;;  %v39_v7 = vld [vmem:[#allocation2 + $0x40] sm:$0xff] }
   0x8   :  { %v38_v8 = vld [vmem:[#allocation2 + $0x38] sm:$0xff]  ;;  %v37_v9 = vld [vmem:[#allocation2 + $0x30] sm:$0xff]  ;;  %v36_v10 = vld [vmem:[#allocation2 + $0x28] sm:$0xff] }
   0x9   :  { %v35_v11 = vld [vmem:[#allocation2 + $0x20] sm:$0xff]  ;;  %v34_v12 = vld [vmem:[#allocation2 + $0x18] sm:$0xff]  ;;  %v33_v13 = vld [vmem:[#allocation2 + $0x10] sm:$0xff] }
   0xa   :  { %52 = vmatpush.xpose.msra.mxu0 %v45_v1  ;;  %v32_v14 = vld [vmem:[#allocation2 + $0x8] sm:$0xff]  ;;  %v31_v15 = vld [vmem:[#allocation2] sm:$0xff] }
   0xb   :  { %v30_v16 = vld [vmem:[%s145_s0] sm:$0xf] }
   0xc   :  { %v81_v17 = vld [vmem:[%s147_s2] ss:$0 sm:$0xff] }
   0xe   :  { %53 = vmatpush.xpose.msra.mxu0 %v44_v2 }
  0x12   :  { %54 = vmatpush.xpose.msra.mxu0 %v43_v3 }
  0x16   :  { %55 = vmatpush.xpose.msra.mxu0 %v42_v4 }
  0x1a   :  { %56 = vmatpush.xpose.msra.mxu0 %v41_v5 }
  0x1e   :  { %57 = vmatpush.xpose.msra.mxu0 %v40_v6 }
  0x22   :  { %58 = vmatpush.xpose.msra.mxu0 %v39_v7 }
  0x26   :  { %59 = vmatpush.xpose.msra.mxu0 %v38_v8 }
  0x2a   :  { %60 = vmatpush.xpose.msra.mxu0 %v37_v9 }
  0x2e   :  { %61 = vmatpush.xpose.msra.mxu0 %v36_v10 }
  0x32   :  { %62 = vmatpush.xpose.msra.mxu0 %v35_v11 }
  0x36   :  { %63 = vmatpush.xpose.msra.mxu0 %v34_v12 }
  0x3a   :  { %64 = vmatpush.xpose.msra.mxu0 %v33_v13 }
  0x3e   :  { %65 = vmatpush.xpose.msra.mxu0 %v32_v14 }
  0x42   :  { %66 = vmatpush.xpose.msra.mxu0 %v31_v15 }
  0x45   :  { %67 = vmatmul.f32.vlgmr.msra.gmra.mxu0 %v30_v16 }
  0xc2   :  { %v68_v18 = vpop.f32.mrf.mxu0 }
  0xc3   :  { %v69_v19 = vadd.f32 %v81_v17, %v68_v18 }
  0xc5   :  { %82 = vtanh.f32 %v69_v19 }
  0xcb   :  { %v83_v20 = vpop.eup %82 }
  0xcc   :  { %72 = vst [vmem:[%s148_s3] sm:$0xf] %v83_v20 }
  0xcd   :  { %77 = vsyncpa [#allocation3], 1 }

</bundles_post_ra>
